<compile_context>
chip_gen: v7x
topology: tpu7x:2x2x1
jax: 0.10.0
libtpu: 0.0.40
codegen_flags: <defaults>
</compile_context>

<pallas_src>
import functools

import jax
import jax.numpy as jnp
from jax import lax
from jax.experimental import pallas as pl
from jax.experimental.pallas import tpu as pltpu


def _round_up(x: int, m: int) -> int:
    return ((x + m - 1) // m) * m


def _cdiv(a: int, b: int) -> int:
    return (a + b - 1) // b


def _bpr_loss_kernel(u_ref, p_ref, n_ref, o_ref, acc_ref, *,
                     l2_decay, l1_decay, pack, d_orig):
    step = pl.program_id(1)

    @pl.when(step == 0)
    def _init():
        acc_ref[...] = jnp.zeros_like(acc_ref)

    u = u_ref[...]
    p = p_ref[...]
    n = n_ref[...]
    if u.dtype != jnp.float32:  # accumulate in f32 (bf16 inputs halve HBM traffic)
        u = u.astype(jnp.float32)
        p = p.astype(jnp.float32)
        n = n.astype(jnp.float32)

    # Score gap with a single elementwise product stream: u * (p - n).
    diff = u * (p - n)                                   # (TB, Dp)

    if pack > 1:
        # Lane-packed rows: segmented per-row sums via a tiny constant 0/1
        # matrix on the (idle) MXU.  seg[j, k] = 1 iff lane j belongs to
        # packed-row segment k.  Built with iota + compares (no int division).
        dp = diff.shape[1]
        j = lax.broadcasted_iota(jnp.int32, (dp, pack), 0)
        k_lo = lax.broadcasted_iota(jnp.int32, (dp, pack), 1) * d_orig
        seg = ((j >= k_lo) & (j < k_lo + d_orig)).astype(jnp.float32)
        x = jnp.dot(diff, seg, preferred_element_type=jnp.float32)  # (TB, pack)
    else:
        x = jnp.sum(diff, axis=1, keepdims=True)         # (TB, 1)

    # Numerically stable logsigmoid: min(x, 0) - log1p(exp(-|x|)).
    logsig = jnp.minimum(x, 0.0) - jnp.log1p(jnp.exp(-jnp.abs(x)))
    if pack > 1:
        logp_tile = jnp.sum(logsig, axis=1, keepdims=True)   # (TB, 1)
    else:
        logp_tile = logsig                                    # (TB, 1)

    # Fused L1/L2 regularization, reduced to (TB, 1) right away (one extra
    # cross-lane reduce; XLU has slack) -> no full-width accumulator RMW.
    reg_elem = (l2_decay * (u * u + p * p + n * n)
                + l1_decay * (jnp.abs(u) + jnp.abs(p) + jnp.abs(n)))
    reg_tile = jnp.sum(reg_elem, axis=1, keepdims=True)       # (TB, 1)

    # Single combined accumulator: sum(reg) - sum(logsigmoid).
    acc_ref[...] += reg_tile - logp_tile

    @pl.when(step == pl.num_programs(1) - 1)
    def _finalize():
        total = jnp.sum(acc_ref[...])
        # Lane/sublane-dense (8, 128) output block per split; wrapper reads [0, 0].
        o_ref[...] = jnp.zeros(o_ref.shape, jnp.float32) + total


def bpr_loss(users, pos_items, neg_items, batch_size,
             l2_decay_ratio=1e-5, l1_decay_ratio=1e-6,
             tile_rows=None, num_splits=2):
    B, D = users.shape
    assert pos_items.shape == (B, D) and neg_items.shape == (B, D)

    # ---- Lane packing for narrow embeddings (D < 128, D | 128) --------------
    if D < 128 and 128 % D == 0:
        pack = 128 // D
    else:
        pack = 1
    Dp = D * pack
    padded_lane = _round_up(Dp, 128)       # real VMEM/vreg lane footprint

    R = _cdiv(B, pack)                     # packed rows

    # ---- Tile sizing (bytes-based, lane-padded footprint) -------------------
    if tile_rows is not None:
        tb = max(8, _round_up(int(tile_rows), 8))      # enforce (8,128) tiling
    else:
        target_block_bytes = 3 * 1024 * 1024           # ~3 MiB per input block
        budget_bytes = 24 * 1024 * 1024                # keep < 32 MiB scoped VMEM
        tb = target_block_bytes // (4 * padded_lane)
        # Live slabs: 3 inputs x 2 pipeline buffers + (tb, 1) acc (lane-padded).
        tb_max = budget_bytes // (6 * 4 * padded_lane + 4 * 128)
        tb = max(8, (min(tb, tb_max) // 8) * 8)
    # Don't use tiles larger than each core-split's share of the batch.
    tb = max(8, min(tb, _round_up(_cdiv(R, num_splits), 8)))

    steps = _cdiv(R, num_splits * tb)      # inner (reduction) grid extent
    Rp = num_splits * steps * tb           # padded packed-row count
    total_rows = Rp * pack
    n_pad = total_rows - B                 # zero-padded original-row slots

    def _prep(x):
        if total_rows != B:
            x = jnp.pad(x, ((0, total_rows - B), (0, 0)))
        return x.reshape(Rp, Dp)           # row-major -> free lane packing

    u = _prep(users)
    p = _prep(pos_items)
    n = _prep(neg_items)

    kernel = functools.partial(
        _bpr_loss_kernel,
        l2_decay=float(l2_decay_ratio),
        l1_decay=float(l1_decay_ratio),
        pack=pack,
        d_orig=D,
    )

    def _in_index(c, i):
        return (c * steps + i, 0)

    def _out_index(c, i):
        return (c, 0)

    in_spec = pl.BlockSpec((tb, Dp), _in_index)
    out_spec = pl.BlockSpec((8, 128), _out_index)

    out = pl.pallas_call(
        kernel,
        out_shape=jax.ShapeDtypeStruct((num_splits * 8, 128), jnp.float32),
        grid_spec=pltpu.PrefetchScalarGridSpec(
            num_scalar_prefetch=0,
            grid=(num_splits, steps),
            in_specs=[in_spec, in_spec, in_spec],
            out_specs=out_spec,
            scratch_shapes=[
                pltpu.VMEM((tb, 1), jnp.float32),   # combined reg - logsig acc
            ],
        ),
        compiler_params=pltpu.CompilerParams(
            # Leading axis: per-TensorCore split (parallel -> megacore on v7x).
            # Inner axis: reduction over batch tiles with a shared accumulator.
            dimension_semantics=("parallel", "arbitrary"),
            vmem_limit_bytes=32 * 1024 * 1024,
        ),
    )(u, p, n)

    partials = out.reshape(num_splits, 8, 128)[:, 0, 0]
    total = jnp.sum(partials)
    # Each zero-padded row slot contributed exactly logsigmoid(0) = -log(2),
    # i.e. +log(2) to the combined (reg - logp) total: subtract it once.
    correction = jnp.float32(n_pad) * jnp.log1p(jnp.float32(1.0))
    return (total - correction) / jnp.float32(batch_size)


def _ref_bpr_loss(users, pos_items, neg_items, batch_size,
                  l2_decay_ratio=1e-5, l1_decay_ratio=1e-6):
    pos_scores = jnp.sum(users * pos_items, axis=1)
    neg_scores = jnp.sum(users * neg_items, axis=1)
    log_prob = jnp.sum(jax.nn.log_sigmoid(pos_scores - neg_scores))
    l2_reg = l2_decay_ratio * (
        jnp.sum(jnp.linalg.norm(users, axis=1) ** 2)
        + jnp.sum(jnp.linalg.norm(pos_items, axis=1) ** 2)
        + jnp.sum(jnp.linalg.norm(neg_items, axis=1) ** 2)
    )
    l1_reg = l1_decay_ratio * (
        jnp.sum(jnp.sum(jnp.abs(users), axis=1))
        + jnp.sum(jnp.sum(jnp.abs(pos_items), axis=1))
        + jnp.sum(jnp.sum(jnp.abs(neg_items), axis=1))
    )
    return (l2_reg + l1_reg - log_prob) / batch_size


if __name__ == "__main__":
    # --- Test 1: tiny shape matching the module's toy usage (lane-packed) -----
    k1, k2, k3 = jax.random.split(jax.random.PRNGKey(0), 3)
    batch_size, hidden = 8, 32
    users = jax.random.normal(k1, (batch_size, hidden), dtype=jnp.float32)
    pos_items = jax.random.normal(k2, (batch_size, hidden), dtype=jnp.float32)
    neg_items = jax.random.normal(k3, (batch_size, hidden), dtype=jnp.float32)

    loss = jax.block_until_ready(bpr_loss(users, pos_items, neg_items, batch_size))
    ref = _ref_bpr_loss(users, pos_items, neg_items, batch_size)
    assert jnp.allclose(loss, ref, rtol=1e-4, atol=1e-5), (loss, ref)

    # --- Test 2: multi-step inner grid + packing + padded-row correction ------
    k4, k5, k6 = jax.random.split(jax.random.PRNGKey(1), 3)
    B2, D2 = 300, 32
    u2 = jax.random.normal(k4, (B2, D2), dtype=jnp.float32)
    p2 = jax.random.normal(k5, (B2, D2), dtype=jnp.float32)
    n2 = jax.random.normal(k6, (B2, D2), dtype=jnp.float32)

    loss2 = jax.block_until_ready(bpr_loss(u2, p2, n2, B2, tile_rows=16))
    ref2 = _ref_bpr_loss(u2, p2, n2, B2)
    assert jnp.allclose(loss2, ref2, rtol=1e-4, atol=1e-4), (loss2, ref2)

    # --- Test 3: unpacked path (D == 128) --------------------------------------
    k7, k8, k9 = jax.random.split(jax.random.PRNGKey(2), 3)
    B3, D3 = 64, 128
    u3 = jax.random.normal(k7, (B3, D3), dtype=jnp.float32)
    p3 = jax.random.normal(k8, (B3, D3), dtype=jnp.float32)
    n3 = jax.random.normal(k9, (B3, D3), dtype=jnp.float32)

    loss3 = jax.block_until_ready(bpr_loss(u3, p3, n3, B3))
    ref3 = _ref_bpr_loss(u3, p3, n3, B3)
    assert jnp.allclose(loss3, ref3, rtol=1e-4, atol=1e-4), (loss3, ref3)

    print("KERNEL_OK")
</pallas_src>

<mosaic_0001>
module attributes {stable_mosaic.version = 11 : i64} {
  func.func @_bpr_loss_kernel(%arg0: i32, %arg1: i32, %arg2: memref<8x128xf32, #tpu.memory_space<vmem>>, %arg3: memref<8x128xf32, #tpu.memory_space<vmem>>, %arg4: memref<8x128xf32, #tpu.memory_space<vmem>>, %arg5: memref<8x128xf32, #tpu.memory_space<vmem>>, %arg6: memref<8x1xf32, #tpu.memory_space<vmem>>) attributes {dimension_semantics = [#tpu.dimension_semantics<parallel>, #tpu.dimension_semantics<arbitrary>], iteration_bounds = array<i64: 2, 1>, scalar_prefetch = 0 : i64, scratch_operands = 1 : i64, tpu.core_type = #tpu.core_type<tc>, window_params = [{transform_indices = @transform_0, window_bounds = array<i64: 8, 128>}, {transform_indices = @transform_1, window_bounds = array<i64: 8, 128>}, {transform_indices = @transform_2, window_bounds = array<i64: 8, 128>}, {transform_indices = @transform_3, window_bounds = array<i64: 8, 128>}]} {
    %c0_i32 = arith.constant 0 : i32
    %0 = arith.cmpi eq, %arg1, %c0_i32 : i32
    %1 = arith.extui %0 : i1 to i32
    %c0_i32_0 = arith.constant 0 : i32
    %2 = arith.cmpi ne, %1, %c0_i32_0 : i32
    scf.if %2 {
      %cst_19 = arith.constant 0.000000e+00 : f32
      %54 = vector.broadcast %cst_19 : f32 to vector<8x1xf32>
      %c0_20 = arith.constant 0 : index
      %c0_21 = arith.constant 0 : index
      %55 = vector.load %arg6[%c0_20, %c0_21] : memref<8x1xf32, #tpu.memory_space<vmem>>, vector<8x1xf32>
      tpu.vector_store %arg6[%c0_20, %c0_21], %54 {strides = array<i32>} : memref<8x1xf32, #tpu.memory_space<vmem>>, vector<8x1xf32>,
    } else {
    }
    %c0 = arith.constant 0 : index
    %c0_1 = arith.constant 0 : index
    %3 = vector.load %arg2[%c0, %c0_1] : memref<8x128xf32, #tpu.memory_space<vmem>>, vector<8x128xf32>
    %c0_2 = arith.constant 0 : index
    %c0_3 = arith.constant 0 : index
    %4 = vector.load %arg3[%c0_2, %c0_3] : memref<8x128xf32, #tpu.memory_space<vmem>>, vector<8x128xf32>
    %c0_4 = arith.constant 0 : index
    %c0_5 = arith.constant 0 : index
    %5 = vector.load %arg4[%c0_4, %c0_5] : memref<8x128xf32, #tpu.memory_space<vmem>>, vector<8x128xf32>
    %6 = arith.subf %4, %5 : vector<8x128xf32>
    %7 = arith.mulf %3, %6 : vector<8x128xf32>
    %8 = tpu.iota {dimensions = array<i32: 0>} : vector<128x4xi32>
    %9 = tpu.iota {dimensions = array<i32: 1>} : vector<128x4xi32>
    %c32_i32 = arith.constant 32 : i32
    %10 = vector.broadcast %c32_i32 : i32 to vector<128x4xi32>
    %11 = arith.muli %9, %10 : vector<128x4xi32>
    %12 = arith.cmpi sge, %8, %11 : vector<128x4xi32>
    %c32_i32_6 = arith.constant 32 : i32
    %13 = vector.broadcast %c32_i32_6 : i32 to vector<128x4xi32>
    %14 = arith.addi %11, %13 : vector<128x4xi32>
    %15 = arith.cmpi slt, %8, %14 : vector<128x4xi32>
    %16 = arith.andi %12, %15 : vector<128x4xi1>
    %17 = arith.extui %16 : vector<128x4xi1> to vector<128x4xi32>
    %18 = arith.sitofp %17 : vector<128x4xi32> to vector<128x4xf32>
    %cst = arith.constant dense<0.000000e+00> : vector<8x4xf32>
    %19 = tpu.matmul %7, %18, %cst {dimension_numbers = #tpu.dot_dimension_numbers<[1], [0], [0], [1], [0, 0, 1, 1], [], []>} : vector<8x128xf32>, vector<128x4xf32>, vector<8x4xf32> -> vector<8x4xf32>
    %cst_7 = arith.constant 0.000000e+00 : f32
    %20 = vector.broadcast %cst_7 : f32 to vector<8x4xf32>
    %21 = arith.minimumf %19, %20 : vector<8x4xf32>
    %22 = math.absf %19 : vector<8x4xf32>
    %cst_8 = arith.constant 0.000000e+00 : f32
    %23 = vector.broadcast %cst_8 : f32 to vector<8x4xf32>
    %24 = arith.subf %23, %22 : vector<8x4xf32>
    %25 = math.exp %24 : vector<8x4xf32>
    %26 = math.log1p %25 : vector<8x4xf32>
    %27 = arith.subf %21, %26 : vector<8x4xf32>
    %cst_9 = arith.constant dense<0.000000e+00> : vector<8xf32>
    %28 = vector.multi_reduction <add>, %27, %cst_9 [1] : vector<8x4xf32> to vector<8xf32>
    %29 = vector.shape_cast %28 : vector<8xf32> to vector<8x1xf32>
    %30 = arith.mulf %3, %3 : vector<8x128xf32>
    %31 = arith.mulf %4, %4 : vector<8x128xf32>
    %32 = arith.addf %30, %31 : vector<8x128xf32>
    %33 = arith.mulf %5, %5 : vector<8x128xf32>
    %34 = arith.addf %32, %33 : vector<8x128xf32>
    %cst_10 = arith.constant 9.99999974E-6 : f32
    %35 = vector.broadcast %cst_10 : f32 to vector<8x128xf32>
    %36 = arith.mulf %35, %34 : vector<8x128xf32>
    %37 = math.absf %3 : vector<8x128xf32>
    %38 = math.absf %4 : vector<8x128xf32>
    %39 = arith.addf %37, %38 : vector<8x128xf32>
    %40 = math.absf %5 : vector<8x128xf32>
    %41 = arith.addf %39, %40 : vector<8x128xf32>
    %cst_11 = arith.constant 9.99999997E-7 : f32
    %42 = vector.broadcast %cst_11 : f32 to vector<8x128xf32>
    %43 = arith.mulf %42, %41 : vector<8x128xf32>
    %44 = arith.addf %36, %43 : vector<8x128xf32>
    %cst_12 = arith.constant dense<0.000000e+00> : vector<8xf32>
    %45 = vector.multi_reduction <add>, %44, %cst_12 [1] : vector<8x128xf32> to vector<8xf32>
    %46 = vector.shape_cast %45 : vector<8xf32> to vector<8x1xf32>
    %c0_13 = arith.constant 0 : index
    %c0_14 = arith.constant 0 : index
    %47 = vector.load %arg6[%c0_13, %c0_14] : memref<8x1xf32, #tpu.memory_space<vmem>>, vector<8x1xf32>
    %48 = arith.subf %46, %29 : vector<8x1xf32>
    %49 = arith.addf %47, %48 : vector<8x1xf32>
    %c0_15 = arith.constant 0 : index
    %c0_16 = arith.constant 0 : index
    %50 = vector.load %arg6[%c0_15, %c0_16] : memref<8x1xf32, #tpu.memory_space<vmem>>, vector<8x1xf32>
    tpu.vector_store %arg6[%c0_15, %c0_16], %49 {strides = array<i32>} : memref<8x1xf32, #tpu.memory_space<vmem>>, vector<8x1xf32>,
    %c0_i32_17 = arith.constant 0 : i32
    %51 = arith.cmpi eq, %arg1, %c0_i32_17 : i32
    %52 = arith.extui %51 : i1 to i32
    %c0_i32_18 = arith.constant 0 : i32
    %53 = arith.cmpi ne, %52, %c0_i32_18 : i32
    scf.if %53 {
      %c0_19 = arith.constant 0 : index
      %c0_20 = arith.constant 0 : index
      %54 = vector.load %arg6[%c0_19, %c0_20] : memref<8x1xf32, #tpu.memory_space<vmem>>, vector<8x1xf32>
      %55 = vector.shape_cast %54 : vector<8x1xf32> to vector<1x8x1xf32>
      %cst_21 = arith.constant dense<0.000000e+00> : vector<1xf32>
      %56 = vector.multi_reduction <add>, %55, %cst_21 [1, 2] : vector<1x8x1xf32> to vector<1xf32>
      %57 = vector.shape_cast %56 : vector<1xf32> to vector<1x1x1xf32>
      %58 = vector.extract %57[0, 0, 0] : f32 from vector<1x1x1xf32>
      %cst_22 = arith.constant 0.000000e+00 : f32
      %59 = vector.broadcast %cst_22 : f32 to vector<8x128xf32>
      %60 = vector.broadcast %58 : f32 to vector<8x128xf32>
      %61 = arith.addf %59, %60 : vector<8x128xf32>
      %c0_23 = arith.constant 0 : index
      %c0_24 = arith.constant 0 : index
      %62 = vector.load %arg5[%c0_23, %c0_24] : memref<8x128xf32, #tpu.memory_space<vmem>>, vector<8x128xf32>
      tpu.vector_store %arg5[%c0_23, %c0_24], %61 {strides = array<i32>} : memref<8x128xf32, #tpu.memory_space<vmem>>, vector<8x128xf32>,
    } else {
    }
    return
  }
  func.func @transform_0(%arg0: i32, %arg1: i32) -> (i32, i32) {
    %c1_i32 = arith.constant 1 : i32
    %0 = arith.muli %arg0, %c1_i32 : i32
    %1 = arith.addi %0, %arg1 : i32
    %c0_i32 = arith.constant 0 : i32
    %c0_i32_0 = arith.constant 0 : i32
    return %1, %c0_i32 : i32, i32
  }
  func.func @transform_1(%arg0: i32, %arg1: i32) -> (i32, i32) {
    %c1_i32 = arith.constant 1 : i32
    %0 = arith.muli %arg0, %c1_i32 : i32
    %1 = arith.addi %0, %arg1 : i32
    %c0_i32 = arith.constant 0 : i32
    %c0_i32_0 = arith.constant 0 : i32
    return %1, %c0_i32 : i32, i32
  }
  func.func @transform_2(%arg0: i32, %arg1: i32) -> (i32, i32) {
    %c1_i32 = arith.constant 1 : i32
    %0 = arith.muli %arg0, %c1_i32 : i32
    %1 = arith.addi %0, %arg1 : i32
    %c0_i32 = arith.constant 0 : i32
    %c0_i32_0 = arith.constant 0 : i32
    return %1, %c0_i32 : i32, i32
  }
  func.func @transform_3(%arg0: i32, %arg1: i32) -> (i32, i32) {
    %c0_i32 = arith.constant 0 : i32
    %c0_i32_0 = arith.constant 0 : i32
    return %arg0, %c0_i32 : i32, i32
  }
}

</mosaic_0001>

<bundles_post_ra>
// kernel: tpu_custom_call.1
= control target key start
LH: loop header
LB: loop body
LE: loop exit
PB: predicated region body
PF: predicated region fallthrough
CT: control target
= control target key end

     0   :  { %s1462_s0 = inlined_call_operand.hbm [shape: f32[16,128], index: 0, kind: input, shape index: {}]   ;;  %s1463_s1 = inlined_call_operand.hbm [shape: f32[16,128], index: 1, kind: input, shape index: {}]   ;;  %s1464_s2 = inlined_call_operand.hbm [shape: f32[16,128], index: 2, kind: input, shape index: {}]   ;;  %s1465_s3 = inlined_call_operand.hbm [shape: f32[16,128], index: 3, kind: output, shape index: {}]  }
   0x1   :  { %1471 = sst [smem:[#allocation16_spill]] %s1463_s1 }
   0x2   :  { %8 = vsyncpa [#allocation4], 0 }
   0x3   :  { %10 = vsyncpa [#allocation4 + $0x1], 0 }
   0x4   :  { %11 = vsyncpa [#allocation7], 0 }
   0x5   :  { %13 = vsyncpa [#allocation7 + $0x1], 0 }
   0x6   :  { %14 = vsyncpa [#allocation5], 0 }
   0x7   :  { %16 = vsyncpa [#allocation5 + $0x1], 0  ;;  %s1072_s12 = smov 0   ;;  %s1074_s13 = smov 0  }
   0x8   :  { %s1076_s14 = smov 0   ;;  %s1078_s15 = smov 0  }
   0x9   :  { %s1080_s16 = smov 0   ;;  %s1082_s17 = smov 0  }
   0xa LB: > { %1472 = sst [smem:[#allocation13_spill]] %s1038_s16  ;;  %s1103_s18 = sadd.s32 4294967295, %s1042_s17   ;;  %s1042_s17 = sphi %s1082_s17, %s22_s17   ;;  %s1038_s16 = sphi %s1080_s16, %s1509_s16   ;;  %s1034_s15 = sphi %s1078_s15, %s1508_s15   ;;  %s1030_s14 = sphi %s1076_s14, %s1512_s14   ;;  %s1026_s13 = sphi %s1074_s13, %s1511_s13   ;;  %s1022_s12 = sphi %s1072_s12, %s1510_s12  }
   0xb   : > { %s658_s19 = sadd.s32 4294967294, %s1042_s17   ;;  %s34_s20 = sadd.s32 1, %s1038_s16 }
   0xc   : > { %s43_s21 = sadd.s32 1, %s1030_s14  ;;  %p36_p0 = scmp.ge.s32.totalorder %s34_s20, 2 }
   0xd   : > { %p50_p1 = scmp.ne.s32.totalorder %s1030_s14, %s1026_s13  ;;  %p51_p2 = scmp.eq.s32.totalorder %s1042_s17, 0 }
   0xe   : > { %p56_p3 = scmp.ne.s32.totalorder %s1026_s13, %s1022_s12  ;;  %s1514_s20 = smov (%p36_p0, %s34_s20), 0 }
   0xf   : > { %1473 = sst [smem:[#allocation14_spill]] %s1514_s20  ;;  %p1115_p4 = por %p51_p2, %p50_p1 }
  0x10   : > { %p57_p5 = scmp.eq.s32.totalorder %s1103_s18, 0  ;;  %s40_s23 = ssub.s32 %s1038_s16, %s1514_s20 }
  0x11   : > { %p136_p6 = scmp.eq.s32.totalorder %s1103_s18, 1  ;;  %p41_p7 = scmp.eq.s32.totalorder %s40_s23, 0 }
  0x12   : > { %p1123_p8 = por %p57_p5, %p56_p3  ;;  %p142_p10 = scmp.eq.s32.totalorder %s658_s19, 1 }
  0x13   : > { %p1127_p9 = por %p136_p6, %p50_p1  ;;  %p808_p13 = scmp.lt.s32.totalorder %s1042_s17, 2 }
  0x14   : > { %s1475_s24 = scalar_select %p1123_p8, 1, 0 }
  0x15   : > { %s1476_s25 = scalar_select %p1127_p9, 1, 0 }
  0x16   : > { %s1132_s26 = scalar_select %p41_p7, %s1030_s14, %s43_s21  }
  0x17   : > { %p1134_p11 = por %p142_p10, %p56_p3  ;;  %s162_s28 = sand.u32 1, %s1030_s14  }
  0x18   : > { %1477 = sst [smem:[#allocation15_spill]] %s1132_s26  ;;  %s1143_s29 = sshll.u32 %s162_s28, 3 }
  0x19   : > { %s1478_s27 = scalar_select %p1134_p11, 1, 0 }
  0x1a   : > { %s1146_s30 = sshll.u32 %s1038_s16, 7  ;;  %p1150_p0 = pnand %p808_p13, %p1115_p4 }
  0x1b   : > { %s181_s5 = sand.u32 1, %s1042_s17   ;;  %s1480_s1 = sld [smem:[#allocation16_spill]] }
  0x1c   : > { %s1479_s4 = scalar_select %p1150_p0, 1, 0 }
  0x1d   : > { %s185_s9 = scalar_lea.vmem [#allocation6], %s1143_s29  ;;  %s1166_s11 = scalar_lea.sflag [#allocation7], %s181_s5 }
  0x1e   : > { %s193_s10 = sshll.u32 %s185_s9, 4  ;;  %p1172_p4 = pneg %p1150_p0  ;;  %s1163_s10 = int_to_ptr.vmem [resolvable:$true] %s193_s10 }
  0x21   : > { %s1159_s8 = scalar_lea.hbm %s1480_s1, %s1146_s30  ;;  %s871_s6 = scalar_lea.hbm %s1480_s1, 256 }
  0x22   : > { %s866_s19 = scalar_lea.hbm %s1159_s8, 128  ;;  %p872_p7 = scmp.lt.u32.totalorder %s1159_s8, %s1480_s1 }
  0x23   : > { %p867_p3 = scmp.ne.s32.totalorder %s1159_s8, %s866_s19  ;;  %p873_p10 = scmp.lt.u32.totalorder %s871_s6, %s866_s19 }
  0x24   : > { %p875_p12 = scmp.lt.u32.totalorder %s866_s19, %s1159_s8 }
  0x25   : > { %p869_p5 = pnand %p1172_p4, %p867_p3  ;;  %p874_p13 = por %p873_p10, %p872_p7 }
  0x27   : > { %p870_p6 = pneg %p869_p5  ;;  %p876_p1 = por %p875_p12, %p874_p13 }
  0x29   : > { %p877_p2 = pnand %p876_p1, %p870_p6 }
  0x2b   : > { %880 = shalt.err (!%p877_p2)
}
  0x2c   : > { %s881_s5 = scalar_lea.vmem %s1163_s10, 128  ;;  %s1044_s22 = smov [#allocation6]  }
  0x2d   : > { %p882_p3 = scmp.ne.s32.totalorder %s1163_s10, %s881_s5  ;;  %s886_s23 = sshll.u32 %s1044_s22, 4  ;;  %s887_s23 = int_to_ptr.vmem [resolvable:$false] %s886_s23 }
  0x2e   : > { %s888_s7 = scalar_lea.vmem %s887_s23, 256  ;;  %p889_p9 = scmp.lt.s32.totalorder %s1163_s10, %s887_s23 }
  0x2f   : > { %p884_p5 = pnand %p882_p3, %p1172_p4  ;;  %p890_p8 = scmp.lt.s32.totalorder %s888_s7, %s881_s5 }
  0x31   : > { %p885_p11 = pneg %p884_p5  ;;  %p891_p7 = por %p890_p8, %p889_p9 }
  0x33   : > { %p892_p10 = pnand %p891_p7, %p885_p11 }
  0x35   : > { %895 = shalt.err (!%p892_p10)
}
  0x36   : > { %800 = dma.hbm_to_vmem [thread:$0]  (!%p1150_p0), %s1159_s8, 128, %s1163_s10, %s1166_s11  }
  0x37   : > { %p1482_p12 = scmp.lt.s32.totalorder %s1042_s17, 3  ;;  %p1483_p1 = scmp.ge.s32.totalorder %s1042_s17, 1 }
  0x38   : > { %s1208_s5 = scalar_lea.hbm %s1462_s0, %s1146_s30  ;;  %s166_s22 = scalar_lea.vmem [#allocation3], %s1143_s29 }
  0x39   : > { %p1200_p2 = pnand %p1483_p1, %p1482_p12  ;;  %s174_s23 = sshll.u32 %s166_s22, 4  ;;  %s1211_s23 = int_to_ptr.vmem [resolvable:$true] %s174_s23 }
  0x3a   : > { %s1217_s7 = scalar_lea.hbm %s1464_s2, %s1146_s30  ;;  %s163_s1 = scalar_lea.sflag [#allocation4], %s162_s28 }
  0x3b   : > { %s1484_s19 = scalar_select %p1200_p2, 1, 0 }
  0x3c   : > { %s896_s20 = scalar_lea.hbm %s1208_s5, 128  ;;  %s901_s16 = scalar_lea.hbm %s1462_s0, 256 }
  0x3d   : > { %p897_p8 = scmp.ne.s32.totalorder %s1208_s5, %s896_s20  ;;  %p902_p6 = scmp.lt.u32.totalorder %s1208_s5, %s1462_s0 }
  0x3e   : > { %p903_p13 = scmp.lt.u32.totalorder %s901_s16, %s896_s20  ;;  %p905_p5 = scmp.lt.u32.totalorder %s896_s20, %s1208_s5 }
  0x3f   : > { %p899_p9 = pnand %p897_p8, %p1172_p4 }
  0x40   : > { %p904_p3 = por %p903_p13, %p902_p6 }
  0x41   : > { %p900_p11 = pneg %p899_p9 }
  0x42   : > { %p906_p7 = por %p905_p5, %p904_p3 }
  0x44   : > { %p907_p10 = pnand %p906_p7, %p900_p11 }
  0x46   : > { %910 = shalt.err (!%p907_p10)
}
  0x47   : > { %s911_s28 = scalar_lea.vmem %s1211_s23, 128  ;;  %s1045_s30 = smov [#allocation3]  }
  0x48   : > { %p912_p12 = scmp.ne.s32.totalorder %s1211_s23, %s911_s28  ;;  %s916_s8 = sshll.u32 %s1045_s30, 4  ;;  %s917_s8 = int_to_ptr.vmem [resolvable:$false] %s916_s8 }
  0x49   : > { %s918_s26 = scalar_lea.vmem %s917_s8, 256  ;;  %p919_p9 = scmp.lt.s32.totalorder %s1211_s23, %s917_s8 }
  0x4a   : > { %p914_p1 = pnand %p912_p12, %p1172_p4  ;;  %p920_p2 = scmp.lt.s32.totalorder %s918_s26, %s911_s28 }
  0x4c   : > { %p915_p8 = pneg %p914_p1  ;;  %p921_p6 = por %p920_p2, %p919_p9 }
  0x4e   : > { %p922_p13 = pnand %p921_p6, %p915_p8 }
  0x50   : > { %925 = shalt.err (!%p922_p13)
}
  0x51   : > { %797 = dma.hbm_to_vmem [thread:$0]  (!%p1150_p0), %s1208_s5, 128, %s1211_s23, %s163_s1  }
  0x52   : > { %s204_s16 = scalar_lea.vmem [#allocation8], %s1143_s29  ;;  %s926_s10 = scalar_lea.hbm %s1217_s7, 128 }
  0x53   : > { %s212_s20 = sshll.u32 %s204_s16, 4  ;;  %p927_p11 = scmp.ne.s32.totalorder %s1217_s7, %s926_s10  ;;  %s213_s20 = int_to_ptr.vmem [resolvable:$true] %s212_s20 }
  0x54   : > { %s931_s22 = scalar_lea.hbm %s1464_s2, 256  ;;  %p932_p5 = scmp.lt.u32.totalorder %s1217_s7, %s1464_s2 }
  0x55   : > { %p929_p2 = pnand %p927_p11, %p1172_p4  ;;  %p933_p7 = scmp.lt.u32.totalorder %s931_s22, %s926_s10 }
  0x56   : > { %p935_p12 = scmp.lt.u32.totalorder %s926_s10, %s1217_s7 }
  0x57   : > { %p930_p3 = pneg %p929_p2  ;;  %p934_p10 = por %p933_p7, %p932_p5 }
  0x59   : > { %p936_p1 = por %p935_p12, %p934_p10 }
  0x5b   : > { %p937_p8 = pnand %p936_p1, %p930_p3 }
  0x5d   : > { %940 = shalt.err (!%p937_p8)
}
  0x5e   : > { %s941_s1 = scalar_lea.vmem %s213_s20, 128  ;;  %s1046_s29 = smov [#allocation8]  }
  0x5f   : > { %p942_p9 = scmp.ne.s32.totalorder %s213_s20, %s941_s1  ;;  %s946_s5 = sshll.u32 %s1046_s29, 4  ;;  %s947_s5 = int_to_ptr.vmem [resolvable:$false] %s946_s5 }
  0x60   : > { %s948_s23 = scalar_lea.vmem %s947_s5, 256  ;;  %p949_p11 = scmp.lt.s32.totalorder %s213_s20, %s947_s5 }
  0x61   : > { %p944_p6 = pnand %p942_p9, %p1172_p4  ;;  %p950_p2 = scmp.lt.s32.totalorder %s948_s23, %s941_s1 }
  0x63   : > { %p945_p13 = pneg %p944_p6  ;;  %p951_p0 = por %p950_p2, %p949_p11 }
  0x65   : > { %p952_p5 = pnand %p951_p0, %p945_p13 }
  0x67   : > { %955 = shalt.err (!%p952_p5)
}
  0x68   : > { %p1485_p7 = scmp.ne.s32.totalorder %s1479_s4, 0  ;;  %p1486_p3 = scmp.ne.s32.totalorder %s1484_s19, 0 }
  0x69   : > { %s1264_s21 = sand.u32 (!%p1486_p3), 1, %s1026_s13   ;;  %p1487_p0 = scmp.ne.s32.totalorder (!%p1486_p3), %s1475_s24, 0 }
  0x6a   : > { %803 = dma.hbm_to_vmem [thread:$0]  (!%p1485_p7), %s1217_s7, 128, %s213_s20, %s1166_s11  }
  0x6b   : > { %221 = sbr.rel (%p1486_p3) target bundleno = 785 (0x311), region = 32  ;;  %s1267_s8 = sshll.u32 (!%p1486_p3), %s1264_s21, 3 }
  0x6c   : > { %s224_s26 = scalar_lea.sflag (!%p1486_p3), [#allocation4], %s1264_s21  ;;  %s227_s16 = scalar_lea.vmem (!%p1486_p3), [#allocation3], %s1267_s8 }
  0x72   : > { %1009 = dma.done.wait (%p1487_p0), %s224_s26, 128  }
  0x73   : > { %1011 = vsyncadd (%p1487_p0), %s224_s26, 4294967168  ;;  %s232_s4 = sand.u32 1, %s1103_s18   ;;  %s236_s19 = scalar_lea.vmem [#allocation6], %s1267_s8  ;;  %v292_v0 = vlaneseq }
  0x74   : > { %s233_s11 = scalar_lea.sflag [#allocation7], %s232_s4 }
  0x75   : > { %1013 = dma.done.wait (%p1487_p0), %s233_s11, 256  }
  0x76   : > { %1015 = vsyncadd (%p1487_p0), %s233_s11, 4294967040  ;;  %v1047_v1 = vmov 0.0|0.0   ;;  %v1282_v2 = vshrl.u32 %v292_v0, 7  ;;  %v310_v3 = vand.u32 127, %v292_v0  ;;  %vm1048_vm0 = vmmov 0   ;;  %v288_v31 = vld [vmem:[%s236_s19] sm:$0xff] }
  0x77   : > { %760 = vmatprep.subr.bf16.mxu0 %v1047_v1  ;;  %v1049_v4 = vmov 0.0   ;;  %v1050_v13 = vmov 1.0|1.0   ;;  %s245_s18 = scalar_lea.vmem [#allocation8], %s1267_s8  ;;  %v287_v34 = vld [vmem:[%s227_s16] sm:$0xff]  ;;  %v483_v44 = vmul.f32 %v288_v31, %v288_v31  ;;  %s277_s24 = scalar_lea.vmem [#allocation9], %s1267_s8 }
  0x78   : > { %757 = vmatprep.mubr.msk.f32.mxu0 %vm1048_vm0, %v1049_v4  ;;  %v294_v5 = vadd.s32 8, %v1282_v2  ;;  %v1286_v6 = vmul.u32 32, %v310_v3  ;;  %v295_v7 = vadd.s32 16, %v1282_v2  ;;  %v296_v9 = vadd.s32 24, %v1282_v2  ;;  %v289_v32 = vld [vmem:[%s245_s18] sm:$0xff]  ;;  %s533_s7 = sshll.u32 %s277_s24, 4  ;;  %s1410_s7 = int_to_ptr.vmem [resolvable:$true] %s533_s7 }
  0x79   : > { %v297_v10 = vadd.s32 32, %v1282_v2  ;;  %v298_v11 = vadd.s32 40, %v1282_v2  ;;  %v299_v12 = vadd.s32 48, %v1282_v2  ;;  %v300_v14 = vadd.s32 56, %v1282_v2  ;;  %s705_s20 = sshll.u32 %s1034_s15, 7  ;;  %s520_s28 = scalar_lea.sflag [#allocation5], %s1264_s21 }
  0x7a   : > { %vm312_vm1 = vcmp.ge.s32.totalorder %v1282_v2, %v1286_v6  ;;  %v1292_v8 = vadd.s32 32, %v1286_v6  ;;  %vm313_vm2 = vcmp.ge.s32.totalorder %v294_v5, %v1286_v6  ;;  %vm314_vm6 = vcmp.ge.s32.totalorder %v295_v7, %v1286_v6  ;;  %s1415_s22 = scalar_lea.hbm %s1465_s3, %s705_s20  ;;  %s956_s30 = scalar_lea.vmem %s1410_s7, 128 }
  0x7b   : > { %vm315_vm9 = vcmp.ge.s32.totalorder %v296_v9, %v1286_v6  ;;  %vm316_vm13 = vcmp.ge.s32.totalorder %v297_v10, %v1286_v6  ;;  %vm317_vm0 = vcmp.ge.s32.totalorder %v298_v11, %v1286_v6  ;;  %v301_v15 = vadd.s32 64, %v1282_v2  ;;  %p957_p4 = scmp.ne.s32.totalorder %s1410_s7, %s956_s30  ;;  %p1504_p10 = scmp.ne.s32.totalorder %s1476_s25, 0 }
  0x7c   : > { %vm329_vm3 = vcmp.lt.s32.totalorder %v1282_v2, %v1292_v8  ;;  %vm330_vm4 = vcmp.lt.s32.totalorder %v294_v5, %v1292_v8  ;;  %vm331_vm7 = vcmp.lt.s32.totalorder %v295_v7, %v1292_v8  ;;  %vm332_vm10 = vcmp.lt.s32.totalorder %v296_v9, %v1292_v8  ;;  %s1051_s15 = smov [#allocation9]  }
  0x7d   : > { %vm345_vm5 = vmand %vm312_vm1, %vm329_vm3  ;;  %vm333_vm14 = vcmp.lt.s32.totalorder %v297_v10, %v1292_v8  ;;  %vm334_vm1 = vcmp.lt.s32.totalorder %v298_v11, %v1292_v8  ;;  %v302_v17 = vadd.s32 72, %v1282_v2  ;;  %v303_v18 = vadd.s32 80, %v1282_v2  ;;  %p958_p12 = pnand %p957_p4, %p1504_p10  ;;  %s960_s1 = sshll.u32 %s1051_s15, 4  ;;  %s961_s1 = int_to_ptr.vmem [resolvable:$false] %s960_s1 }
  0x7e   : > { %vm346_vm8 = vmand %vm313_vm2, %vm330_vm4  ;;  %vm318_vm4 = vcmp.ge.s32.totalorder %v299_v12, %v1286_v6  ;;  %v304_v20 = vadd.s32 88, %v1282_v2  ;;  %v305_v23 = vadd.s32 96, %v1282_v2  ;;  %v306_v25 = vadd.s32 104, %v1282_v2  ;;  %s962_s29 = scalar_lea.vmem %s961_s1, 256  ;;  %p963_p8 = scmp.lt.s32.totalorder %s1410_s7, %s961_s1 }
  0x7f   : > { %vm761_vm11 = vmpackc.low %vm346_vm8, %vm345_vm5  ;;  %vm335_vm5 = vcmp.lt.s32.totalorder %v299_v12, %v1292_v8  ;;  %vm336_vm8 = vcmp.lt.s32.totalorder %v300_v14, %v1292_v8  ;;  %v307_v28 = vadd.s32 112, %v1282_v2  ;;  %v308_v29 = vadd.s32 120, %v1282_v2  ;;  %p959_p1 = pneg %p958_p12  ;;  %p964_p9 = scmp.lt.s32.totalorder %s962_s29, %s956_s30 }
  0x80   : > { %762 = vmatpush3.bf16.msk.msra.mxu0 %vm761_vm11, %v1050_v13  ;;  %vm347_vm12 = vmand %vm314_vm6, %vm331_vm7  ;;  %vm319_vm7 = vcmp.ge.s32.totalorder %v300_v14, %v1286_v6  ;;  %vm320_vm11 = vcmp.ge.s32.totalorder %v301_v15, %v1286_v6  ;;  %v290_v33 = vsub.f32 %v288_v31, %v289_v32  ;;  %v482_v43 = vmul.f32 %v287_v34, %v287_v34 }
  0x81   : > { %763 = vmatprep.subr.bf16.mxu0 %v1047_v1  ;;  %vm348_vm15 = vmand %vm315_vm9, %vm332_vm10  ;;  %v488_v45 = vand.u32 2147483647, %v287_v34  ;;  %v489_v46 = vand.u32 2147483647, %v288_v31  ;;  %v485_v49 = vmul.f32 %v289_v32, %v289_v32  ;;  %v491_v51 = vand.u32 2147483647, %v289_v32  ;;  %p965_p6 = por %p964_p9, %p963_p8 }
  0x82   : > { %vm764_vm2 = vmpackc.low %vm348_vm15, %vm347_vm12  ;;  %vm337_vm12 = vcmp.lt.s32.totalorder %v301_v15, %v1292_v8  ;;  %vm338_vm15 = vcmp.lt.s32.totalorder %v302_v17, %v1292_v8  ;;  %v291_v35 = vmul.f32 %v290_v33, %v287_v34  ;;  %v484_v48 = vadd.f32 %v483_v44, %v482_v43 }
  0x83   : > { %vm1314_vm3 = vmand %vm316_vm13, %vm333_vm14  ;;  %vm321_vm14 = vcmp.ge.s32.totalorder %v302_v17, %v1286_v6  ;;  %v490_v50 = vadd.f32 %v489_v46, %v488_v45  ;;  %p966_p13 = pnand %p965_p6, %p959_p1 }
  0x84   : > { %765 = vmatpush3.bf16.msk.msra.mxu0 %vm764_vm2, %v1050_v13  ;;  %vm350_vm6 = vmand %vm317_vm0, %vm334_vm1  ;;  %vm322_vm2 = vcmp.ge.s32.totalorder %v303_v18, %v1286_v6  ;;  %v486_v54 = vadd.f32 %v485_v49, %v484_v48 }
  0x85   : > { %766 = vmatprep.subr.bf16.mxu0 %v1047_v1  ;;  %vm767_vm9 = vmpackc.low %vm350_vm6, %vm1314_vm3  ;;  %vm339_vm3 = vcmp.lt.s32.totalorder %v303_v18, %v1292_v8  ;;  %vm340_vm6 = vcmp.lt.s32.totalorder %v304_v20, %v1292_v8  ;;  %v492_v55 = vadd.f32 %v491_v51, %v490_v50 }
  0x86   : > { %vm1328_vm10 = vmand %vm318_vm4, %vm335_vm5  ;;  %vm323_vm5 = vcmp.ge.s32.totalorder %v304_v20, %v1286_v6  ;;  %v487_v61 = vmul.f32 1e-05, %v486_v54 }
  0x87   : > { %vm1335_vm13 = vmand %vm319_vm7, %vm336_vm8  ;;  %v493_v62 = vmul.f32 1e-06, %v492_v55 }
  0x88   : > { %768 = vmatpush3.bf16.msk.msra.mxu0 %vm767_vm9, %v1050_v13  ;;  %vm770_vm0 = vmpackc.low %vm1335_vm13, %vm1328_vm10  ;;  %vm324_vm10 = vcmp.ge.s32.totalorder %v305_v23, %v1286_v6  ;;  %vm342_vm13 = vcmp.lt.s32.totalorder %v306_v25, %v1292_v8 }
  0x89   : > { %769 = vmatprep.subr.bf16.mxu0 %v1047_v1  ;;  %vm1347_vm1 = vmand %vm320_vm11, %vm337_vm12  ;;  %vm341_vm11 = vcmp.lt.s32.totalorder %v305_v23, %v1292_v8  ;;  %vm325_vm12 = vcmp.ge.s32.totalorder %v306_v25, %v1286_v6 }
  0x8a   : > { %vm1354_vm4 = vmand %vm321_vm14, %vm338_vm15 }
  0x8b   : > { %vm773_vm7 = vmpackc.low %vm1354_vm4, %vm1347_vm1  ;;  %vm326_vm1 = vcmp.ge.s32.totalorder %v307_v28, %v1286_v6  ;;  %vm344_vm4 = vcmp.lt.s32.totalorder %v308_v29, %v1292_v8 }
  0x8c   : > { %771 = vmatpush3.bf16.msk.msra.mxu0 %vm770_vm0, %v1050_v13  ;;  %vm1366_vm8 = vmand %vm322_vm2, %vm339_vm3  ;;  %vm343_vm2 = vcmp.lt.s32.totalorder %v307_v28, %v1292_v8  ;;  %vm327_vm3 = vcmp.ge.s32.totalorder %v308_v29, %v1286_v6 }
  0x8d   : > { %772 = vmatprep.subr.bf16.mxu0 %v1047_v1  ;;  %vm1371_vm9 = vmand %vm323_vm5, %vm340_vm6 }
  0x8e   : > { %vm776_vm14 = vmpackc.low %vm1371_vm9, %vm1366_vm8 }
  0x8f   : > { %vm1386_vm15 = vmand %vm324_vm10, %vm341_vm11  ;;  %vm478_vm10 = vcmask 31744   ;;  %vm285_vm11 = vcmask 7168  }
  0x90   : > { %774 = vmatpush3.bf16.msk.msra.mxu0 %vm773_vm7, %v1050_v13  ;;  %vm358_vm0 = vmand %vm325_vm12, %vm342_vm13  ;;  %286 = vst.msk [vmem:[#allocation2] sm:$0xff] %vm285_vm11, %v1049_v4 }
  0x91   : > { %775 = vmatprep.subr.bf16.mxu0 %v1047_v1  ;;  %vm779_vm5 = vmpackc.low %vm358_vm0, %vm1386_vm15 }
  0x92   : > { %vm359_vm6 = vmand %vm326_vm1, %vm343_vm2 }
  0x93   : > { %vm360_vm7 = vmand %vm327_vm3, %vm344_vm4 }
  0x94   : > { %777 = vmatpush3.bf16.msk.msra.mxu0 %vm776_vm14, %v1050_v13  ;;  %vm782_vm8 = vmpackc.low %vm360_vm7, %vm359_vm6 }
  0x95   : > { %778 = vmatprep.subr.bf16.mxu0 %v1047_v1 }
  0x97   : > { %v497_v5 = vld [vmem:[#allocation2] sm:$0xff] }
  0x98   : > { %780 = vmatpush3.bf16.msk.msra.mxu0 %vm779_vm5, %v1050_v13 }
  0x99   : > { %781 = vmatprep.subr.bf16.mxu0 %v1047_v1  ;;  %v494_v1 = vadd.f32 %v493_v62, %v487_v61 }
  0x9c   : > { %783 = vmatpush3.bf16.msk.msra.mxu0 %vm782_vm8, %v1050_v13 }
  0x9f   : > { %758 = vmatmul.mubr.f32.vlgmr.msra.gmra.mrb[0].mxu0 %v291_v35 }
 0x172   : > { %v459_v36 = vpop.f32.mrb[0].mxu0 }
 0x173   : > { %v464_v37 = vand.u32 2147483647, %v459_v36  ;;  %v759_v38 = vpop.f32.mrb[1].mxu0  ;;  %v463_v59 = vmin.f32 %v459_v36, 0.0 }
 0x175   : > { %v465_v39 = vsub.f32 0.0, %v464_v37 }
 0x177   : > { %v466_v40 = vmul.f32 1.442695, %v465_v39 }
 0x179   : > { %862 = vpow2.f32 %v466_v40 }
 0x183   : > { %v863_v41 = vpop.eup %862 }
 0x184   : > { %v468_v42 = vadd.f32 1.0, %v863_v41  ;;  %v471_v47 = vmul.f32 -0.5, %v863_v41  ;;  %v474_v53 = vand.u32 2147483647, %v863_v41 }
 0x186   : > { %864 = vlog2.f32 %v468_v42  ;;  %v472_v52 = vadd.f32 1.0, %v471_v47  ;;  %vm475_vm9 = vcmp.lt.f32.partialorder %v474_v53, 0.0004427343 }
 0x188   : > { %v473_v58 = vmul.f32 %v863_v41, %v472_v52 }
 0x190   : > { %v865_v56 = vpop.eup %864 }
 0x191   : > { %v470_v57 = vmul.f32 0.6931472, %v865_v56 }
 0x193   : > { %v476_v60 = vsel %vm475_vm9, %v473_v58, %v470_v57 }
 0x194   : > { %v477_v63 = vsub.f32 %v463_v59, %v476_v60 }
 0x196   : > { %v479_v0 = vsel %vm478_vm10, %v477_v63, 0.0 }
 0x197   : > { %480 = vadd.xlane.f32.xlu0 %v479_v0 }
 0x19b   : > { %495 = vadd.xlane.f32.xlu0 %v494_v1 }
 0x224   : > { %v481_v2 = vpop.xlane.xlu0 %480 }
 0x228   : > { %v496_v3 = vpop.xlane.xlu0 %495 }
 0x229   : > { %v498_v6 = vsub.f32 %v496_v3, %v481_v2 }
 0x22b   : > { %v499_v7 = vadd.f32 %v498_v6, %v497_v5 }
 0x22d   : > { %501 = vst.msk [vmem:[#allocation2] sm:$0xff] %vm285_vm11, %v499_v7 }
 0x234   : > { %v505_v8 = vld [vmem:[#allocation2] sm:$0xff] }
 0x235   : > { %v506_v9 = vsel %vm285_vm11, %v505_v8, 0.0 }
 0x236   : > { %507 = vadd.xlane.f32.xlu1 %v506_v9 }
 0x2c3   : > { %v508_v10 = vpop.xlane.xlu1 %507 }
 0x2c4   : > { %v509_v11 = vrot.slane %v508_v10, 4 }
 0x2c6   : > { %v510_v12 = vadd.f32 %v509_v11, %v508_v10 }
 0x2c8   : > { %v511_v13 = vrot.slane %v510_v12, 2 }
 0x2ca   : > { %v512_v14 = vadd.f32 %v511_v13, %v510_v12 }
 0x2cc   : > { %v513_v15 = vrot.slane %v512_v14, 1 }
 0x2ce   : > { %v514_v4 = vadd.f32 %v513_v15, %v512_v14 }
 0x2d0   : > { %784 = vpush %v514_v4 }
 0x301   : > { %s785_s10 = spop %784 }
 0x302   : > { %v516_v16 = vstv %s785_s10 }
 0x303   : > { %518 = vst [vmem:[%s277_s24] sm:$0xff] %v516_v16 }
 0x304   : > { %969 = shalt.err (!%p966_p13)
}
 0x305   : > { %s970_s5 = scalar_lea.hbm %s1415_s22, 128  ;;  %s974_s8 = scalar_lea.hbm %s1465_s3, 256 }
 0x306   : > { %p971_p11 = scmp.ne.s32.totalorder %s1415_s22, %s970_s5  ;;  %p975_p7 = scmp.lt.u32.totalorder %s1415_s22, %s1465_s3 }
 0x307   : > { %p976_p3 = scmp.lt.u32.totalorder %s974_s8, %s970_s5  ;;  %p978_p4 = scmp.lt.u32.totalorder %s970_s5, %s1415_s22 }
 0x308   : > { %p972_p2 = pnand %p971_p11, %p1504_p10 }
 0x309   : > { %p977_p0 = por %p976_p3, %p975_p7 }
 0x30a   : > { %p973_p5 = pneg %p972_p2 }
 0x30b   : > { %p979_p12 = por %p978_p4, %p977_p0 }
 0x30d   : > { %p980_p1 = pnand %p979_p12, %p973_p5 }
 0x30f   : > { %983 = shalt.err (!%p980_p1)
}
 0x310   : > { %792 = dma.vmem_to_hbm [thread:$0]  (%p1504_p10), %s1410_s7, 128, %s1415_s22, %s520_s28  }
 0x311 PF: > { %s545_s4 = sand.u32 1, %s1022_s12   ;;  %p1505_p8 = scmp.ne.s32.totalorder %s1478_s27, 0 }
 0x312   : > { %p1506_p9 = scmp.ge.s32.totalorder %s1042_s17, 2  ;;  %s546_s11 = scalar_lea.sflag [#allocation5], %s545_s4 }
 0x314   : > { %p805_p6 = pnand %p1506_p9, %p1505_p8 }
 0x316   : > { %1017 = dma.done.wait (!%p805_p6), %s546_s11, 128  }
 0x317   : > { %1019 = vsyncadd (!%p805_p6), %s546_s11, 4294967168  ;;  %s22_s17 = sadd.s32 1, %s1042_s17   ;;  %s1507_s25 = sld [smem:[#allocation15_spill]] }
 0x318   : > { %p19_p13 = scmp.ge.s32.totalorder %s22_s17, 4   ;;  %s1508_s15 = sld [smem:[#allocation13_spill]] }
 0x319   : > { %s1509_s16 = sld [smem:[#allocation14_spill]]  ;;  %s1510_s12 = smov %s1026_s13 }
 0x31a   : > { %s1511_s13 = smov %s1030_s14  ;;  %21 = sbr.rel (!%p19_p13) target bundleno = 10 (0xa), region = 109 }
 0x31d   : > { %s1512_s14 = smov %s1507_s25 }
 0x321   :  { %551 = vsyncpa [#allocation4], 1 }
 0x322   :  { %553 = vsyncpa [#allocation4 + $0x1], 1 }
 0x323   :  { %554 = vsyncpa [#allocation7], 1 }
 0x324   :  { %556 = vsyncpa [#allocation7 + $0x1], 1 }
 0x325   :  { %557 = vsyncpa [#allocation5], 1 }
 0x326   :  { %559 = vsyncpa [#allocation5 + $0x1], 1 }

</bundles_post_ra>
